<compile_context>
chip_gen: v7x
topology: tpu7x:2x2x1
jax: 0.10.0
libtpu: 0.0.40
codegen_flags: <defaults>
</compile_context>

<pallas_src>
import jax
import jax.numpy as jnp
from jax.experimental import pallas as pl
from jax.experimental.pallas import tpu as pltpu


def _multimodel_kernel(x_ref, w_ref, b_ref, o_ref, acc_ref):
    # x_ref: (B, tk), w_ref: (tk, tn), b_ref: (1, tn), o_ref: (B, tn)
    k = pl.program_id(1)

    @pl.when(k == 0)
    def _():
        acc_ref[...] = jnp.zeros_like(acc_ref)

    acc_ref[...] += jnp.dot(
        x_ref[...], w_ref[...], preferred_element_type=jnp.float32
    )

    @pl.when(k == pl.num_programs(1) - 1)
    def _():
        o_ref[...] = (acc_ref[...] + b_ref[...]).astype(o_ref.dtype)


def _pick_tile(total, target, align):
    """Largest multiple of `align` that divides `total` and is <= target
    (falls back to `total` itself if no aligned divisor exists)."""
    if total <= target:
        return total
    best = None
    t = align
    while t <= target:
        if total % t == 0:
            best = t
        t += align
    return best if best is not None else total


def multimodel_forward(x, weights, biases):
    """x: [B, D]; weights: [M, D, H]; biases: [M, H] -> [B, M*H] (torch.cat dim=1)."""
    B, D = x.shape
    M, _, H = weights.shape
    N = M * H

    # Fuse the per-model weights into a single [D, M*H] matrix so one matmul
    # produces the concatenated output directly (one-time parameter packing).
    w_cat = jnp.transpose(weights, (1, 0, 2)).reshape(D, N)
    b_cat = biases.reshape(1, N)

    # Tile fused-N (lane dim, 128-aligned) and the contraction D (128-aligned)
    # so the double-buffered weight working set stays well under VMEM even on
    # v7x (64 MiB).  At demo sizes: tn = N, tk = D, grid = (1, 1).
    tn = _pick_tile(N, 2048, 128)
    tk = _pick_tile(D, 2048, 128)
    grid = (N // tn, D // tk)

    itemsize = jnp.dtype(x.dtype).itemsize
    cost = pl.CostEstimate(
        flops=2 * B * D * N,
        transcendentals=0,
        bytes_accessed=(B * D + D * N + N + B * N) * itemsize,
    )

    out = pl.pallas_call(
        _multimodel_kernel,
        out_shape=jax.ShapeDtypeStruct((B, N), x.dtype),
        grid_spec=pltpu.PrefetchScalarGridSpec(
            num_scalar_prefetch=0,
            grid=grid,
            in_specs=[
                pl.BlockSpec((B, tk), lambda j, k: (0, k)),   # shared input x
                pl.BlockSpec((tk, tn), lambda j, k: (k, j)),  # fused weight cols
                pl.BlockSpec((1, tn), lambda j, k: (0, j)),   # fused bias cols
            ],
            out_specs=pl.BlockSpec((B, tn), lambda j, k: (0, j)),
            scratch_shapes=[pltpu.VMEM((B, tn), jnp.float32)],
        ),
        compiler_params=pltpu.CompilerParams(
            dimension_semantics=("parallel", "arbitrary"),
        ),
        cost_estimate=cost,
    )(x, w_cat, b_cat)

    return out  # already [B, M*H] == torch.cat([m(x) for m in models], dim=1)


if __name__ == "__main__":
    # Small shapes consistent with the forward: batch=8, in-features=128,
    # hidden=128 per submodel, 2 submodels.
    B, D, H, M = 8, 128, 128, 2

    key = jax.random.PRNGKey(0)
    kx, kw, kb = jax.random.split(key, 3)

    x = jax.random.normal(kx, (B, D), dtype=jnp.float32)
    weights = jax.random.normal(kw, (M, D, H), dtype=jnp.float32) * 0.02
    biases = jax.random.normal(kb, (M, H), dtype=jnp.float32) * 0.01

    y = multimodel_forward(x, weights, biases)
    y = jax.block_until_ready(y)

    # Pure-JAX reference of the MultiModel semantics (per-model dots + cat).
    ref = jnp.concatenate([x @ weights[i] + biases[i] for i in range(M)], axis=1)
    assert y.shape == (B, M * H)
    assert jnp.allclose(y, ref, atol=1e-4, rtol=1e-4)

    # TODO(synk): the BatchEncoding / different_inputs / random_input branches are
    # host-side control flow over tokenizer objects and have no Pallas equivalent;
    # only the default forward path (shared input, cat(dim=1)) is implemented.
    print("KERNEL_OK")
</pallas_src>

<mosaic_0001>
module attributes {stable_mosaic.version = 11 : i64} {
  func.func @_multimodel_kernel(%arg0: i32, %arg1: i32, %arg2: memref<8x128xf32, #tpu.memory_space<vmem>>, %arg3: memref<128x256xf32, #tpu.memory_space<vmem>>, %arg4: memref<1x256xf32, #tpu.memory_space<vmem>>, %arg5: memref<8x256xf32, #tpu.memory_space<vmem>>, %arg6: memref<8x256xf32, #tpu.memory_space<vmem>>) attributes {dimension_semantics = [#tpu.dimension_semantics<parallel>, #tpu.dimension_semantics<arbitrary>], iteration_bounds = array<i64: 1, 1>, scalar_prefetch = 0 : i64, scratch_operands = 1 : i64, tpu.core_type = #tpu.core_type<tc>, window_params = [{transform_indices = @transform_0, window_bounds = array<i64: 8, 128>}, {transform_indices = @transform_1, window_bounds = array<i64: 128, 256>}, {transform_indices = @transform_2, window_bounds = array<i64: 1, 256>}, {transform_indices = @transform_3, window_bounds = array<i64: 8, 256>}]} {
    %c0_i32 = arith.constant 0 : i32
    %0 = arith.cmpi eq, %arg1, %c0_i32 : i32
    %1 = arith.extui %0 : i1 to i32
    %c0_i32_0 = arith.constant 0 : i32
    %2 = arith.cmpi ne, %1, %c0_i32_0 : i32
    scf.if %2 {
      %cst_10 = arith.constant 0.000000e+00 : f32
      %12 = vector.broadcast %cst_10 : f32 to vector<8x256xf32>
      %c0_11 = arith.constant 0 : index
      %c0_12 = arith.constant 0 : index
      %13 = vector.load %arg6[%c0_11, %c0_12] : memref<8x256xf32, #tpu.memory_space<vmem>>, vector<8x256xf32>
      tpu.vector_store %arg6[%c0_11, %c0_12], %12 {strides = array<i32>} : memref<8x256xf32, #tpu.memory_space<vmem>>, vector<8x256xf32>,
    } else {
    }
    %c0 = arith.constant 0 : index
    %c0_1 = arith.constant 0 : index
    %3 = vector.load %arg6[%c0, %c0_1] : memref<8x256xf32, #tpu.memory_space<vmem>>, vector<8x256xf32>
    %c0_2 = arith.constant 0 : index
    %c0_3 = arith.constant 0 : index
    %4 = vector.load %arg2[%c0_2, %c0_3] : memref<8x128xf32, #tpu.memory_space<vmem>>, vector<8x128xf32>
    %c0_4 = arith.constant 0 : index
    %c0_5 = arith.constant 0 : index
    %5 = vector.load %arg3[%c0_4, %c0_5] : memref<128x256xf32, #tpu.memory_space<vmem>>, vector<128x256xf32>
    %cst = arith.constant dense<0.000000e+00> : vector<8x256xf32>
    %6 = tpu.matmul %4, %5, %cst {dimension_numbers = #tpu.dot_dimension_numbers<[1], [0], [0], [1], [0, 0, 1, 1], [], []>} : vector<8x128xf32>, vector<128x256xf32>, vector<8x256xf32> -> vector<8x256xf32>
    %7 = arith.addf %3, %6 : vector<8x256xf32>
    %c0_6 = arith.constant 0 : index
    %c0_7 = arith.constant 0 : index
    %8 = vector.load %arg6[%c0_6, %c0_7] : memref<8x256xf32, #tpu.memory_space<vmem>>, vector<8x256xf32>
    tpu.vector_store %arg6[%c0_6, %c0_7], %7 {strides = array<i32>} : memref<8x256xf32, #tpu.memory_space<vmem>>, vector<8x256xf32>,
    %c0_i32_8 = arith.constant 0 : i32
    %9 = arith.cmpi eq, %arg1, %c0_i32_8 : i32
    %10 = arith.extui %9 : i1 to i32
    %c0_i32_9 = arith.constant 0 : i32
    %11 = arith.cmpi ne, %10, %c0_i32_9 : i32
    scf.if %11 {
      %c0_10 = arith.constant 0 : index
      %c0_11 = arith.constant 0 : index
      %12 = vector.load %arg6[%c0_10, %c0_11] : memref<8x256xf32, #tpu.memory_space<vmem>>, vector<8x256xf32>
      %c0_12 = arith.constant 0 : index
      %c0_13 = arith.constant 0 : index
      %13 = vector.load %arg4[%c0_12, %c0_13] : memref<1x256xf32, #tpu.memory_space<vmem>>, vector<1x256xf32>
      %14 = vector.broadcast %13 : vector<1x256xf32> to vector<8x256xf32>
      %15 = arith.addf %12, %14 : vector<8x256xf32>
      %c0_14 = arith.constant 0 : index
      %c0_15 = arith.constant 0 : index
      %16 = vector.load %arg5[%c0_14, %c0_15] : memref<8x256xf32, #tpu.memory_space<vmem>>, vector<8x256xf32>
      tpu.vector_store %arg5[%c0_14, %c0_15], %15 {strides = array<i32>} : memref<8x256xf32, #tpu.memory_space<vmem>>, vector<8x256xf32>,
    } else {
    }
    return
  }
  func.func @transform_0(%arg0: i32, %arg1: i32) -> (i32, i32) {
    %c0_i32 = arith.constant 0 : i32
    %c0_i32_0 = arith.constant 0 : i32
    return %c0_i32, %arg1 : i32, i32
  }
  func.func @transform_1(%arg0: i32, %arg1: i32) -> (i32, i32) {
    %c0_i32 = arith.constant 0 : i32
    return %arg1, %arg0 : i32, i32
  }
  func.func @transform_2(%arg0: i32, %arg1: i32) -> (i32, i32) {
    %c0_i32 = arith.constant 0 : i32
    %c0_i32_0 = arith.constant 0 : i32
    return %c0_i32, %arg0 : i32, i32
  }
  func.func @transform_3(%arg0: i32, %arg1: i32) -> (i32, i32) {
    %c0_i32 = arith.constant 0 : i32
    %c0_i32_0 = arith.constant 0 : i32
    return %c0_i32, %arg0 : i32, i32
  }
}

</mosaic_0001>

<bundles_post_ra>
// kernel: tpu_custom_call.1
= control target key start
LH: loop header
LB: loop body
LE: loop exit
PB: predicated region body
PF: predicated region fallthrough
CT: control target
= control target key end

     0   :  { %8 = vsyncpa [#allocation4], 0  ;;  %s376_s0 = inlined_call_operand.hbm [shape: f32[8,128], index: 0, kind: input, shape index: {}]   ;;  %s377_s1 = inlined_call_operand.hbm [shape: f32[128,256], index: 1, kind: input, shape index: {}]   ;;  %s378_s2 = inlined_call_operand.vmem [shape: f32[1,256], index: 2, kind: input, shape index: {}]   ;;  %s379_s3 = inlined_call_operand.hbm [shape: f32[8,256], index: 3, kind: output, shape index: {}]  }
   0x1   :  { %9 = vsyncpa [#allocation7], 0 }
   0x2   :  { %10 = vsyncpa [#allocation5], 0  ;;  %s304_s12 = smov [#allocation3]   ;;  %s305_s14 = smov [#allocation6]  }
   0x3   :  { %s17_s13 = sshll.u32 %s304_s12, 4  ;;  %s26_s15 = sshll.u32 %s305_s14, 4  ;;  %s18_s13 = int_to_ptr.vmem [resolvable:$true] %s17_s13  ;;  %s330_s15 = int_to_ptr.vmem [resolvable:$true] %s26_s15 }
   0x4   :  { %s232_s18 = scalar_lea.hbm %s376_s0, 128 }
   0x5   :  { %p233_p0 = scmp.ne.s32.totalorder %s376_s0, %s232_s18  ;;  %p236_p1 = scmp.lt.u32.totalorder %s232_s18, %s376_s0 }
   0x7   :  { %p238_p2 = pnand %p236_p1, %p233_p0 }
   0x9   :  { %241 = shalt.err (!%p238_p2)
}
   0xa   :  { %s242_s23 = scalar_lea.vmem %s18_s13, 128  ;;  %p247_p4 = scmp.lt.s32.totalorder %s18_s13, %s18_s13 }
   0xb   :  { %p243_p3 = scmp.ne.s32.totalorder %s18_s13, %s242_s23  ;;  %p248_p5 = scmp.lt.s32.totalorder %s242_s23, %s242_s23 }
   0xd   :  { %p249_p6 = por %p248_p5, %p247_p4 }
   0xf   :  { %p250_p7 = pnand %p249_p6, %p243_p3 }
  0x11   :  { %253 = shalt.err (!%p250_p7)
}
  0x12   :  { %20 = dma.hbm_to_vmem [thread:$0]  %s376_s0, 128, %s18_s13, [#allocation4]  }
  0x13   :  { %s254_s28 = scalar_lea.hbm %s377_s1, 4096 }
  0x14   :  { %p255_p8 = scmp.ne.s32.totalorder %s377_s1, %s254_s28  ;;  %p258_p9 = scmp.lt.u32.totalorder %s254_s28, %s377_s1 }
  0x16   :  { %p260_p10 = pnand %p258_p9, %p255_p8 }
  0x18   :  { %263 = shalt.err (!%p260_p10)
}
  0x19   :  { %s264_s6 = scalar_lea.vmem %s330_s15, 4096  ;;  %p269_p12 = scmp.lt.s32.totalorder %s330_s15, %s330_s15 }
  0x1a   :  { %p265_p11 = scmp.ne.s32.totalorder %s330_s15, %s264_s6  ;;  %p270_p13 = scmp.lt.s32.totalorder %s264_s6, %s264_s6 }
  0x1c   :  { %p271_p0 = por %p270_p13, %p269_p12 }
  0x1e   :  { %p272_p1 = pnand %p271_p0, %p265_p11 }
  0x20   :  { %275 = shalt.err (!%p272_p1)
}
  0x21   :  { %s306_s0 = smov 256   ;;  %s307_s7 = smov 16  }
  0x22   :  { %32 = dma.hbm_to_vmem [thread:$0]  %s377_s1, 4096, %s330_s15, [#allocation7], %s306_s0, %s306_s0, %s307_s7  }
  0x23   :  { %298 = dma.done.wait [#allocation4], 128  }
  0x24   :  { %299 = vsyncadd [#allocation4], 4294967168 }
  0x25   :  { %300 = dma.done.wait [#allocation7], 4096  }
  0x26   :  { %301 = vsyncadd [#allocation7], 4294963200  ;;  %v308_v0 = vmov 0.0   ;;  %v51_v1 = vld [vmem:[#allocation6 + $0x8] sm:$0xff]  ;;  %v53_v2 = vld [vmem:[#allocation6 + $0x18] sm:$0xff]  ;;  %v164_v50 = vlaneseq  ;;  %s309_s11 = smov [#allocation8]  }
  0x27   :  { %146 = vmatprep.mubr.f32.mxu0 %v308_v0  ;;  %v50_v3 = vld [vmem:[#allocation6] sm:$0xff]  ;;  %v194_v4 = vpack.c.bf16 %v53_v2, %v51_v1  ;;  %v52_v5 = vld [vmem:[#allocation6 + $0x10] sm:$0xff]  ;;  %v55_v6 = vld [vmem:[#allocation6 + $0x28] sm:$0xff]  ;;  %s184_s12 = sshll.u32 %s309_s11, 4  ;;  %s185_s12 = int_to_ptr.vmem [resolvable:$true] %s184_s12 }
  0x28   :  { %v57_v7 = vld [vmem:[#allocation6 + $0x38] sm:$0xff]  ;;  %v196_v8 = vpack.c.bf16 %v52_v5, %v50_v3  ;;  %v54_v10 = vld [vmem:[#allocation6 + $0x20] sm:$0xff]  ;;  %v56_v11 = vld [vmem:[#allocation6 + $0x30] sm:$0xff]  ;;  %v165_v51 = vshrl.u32 %v164_v50, 7  ;;  %s276_s13 = scalar_lea.vmem %s185_s12, 256  ;;  %p281_p3 = scmp.lt.s32.totalorder %s185_s12, %s185_s12 }
  0x29   :  { %v198_v9 = vpack.c.bf16 %v57_v7, %v55_v6  ;;  %v59_v12 = vld [vmem:[#allocation6 + $0x48] sm:$0xff]  ;;  %195 = vmatprep.subr.bf16.mxu0 %v194_v4  ;;  %v61_v13 = vld [vmem:[#allocation6 + $0x58] sm:$0xff]  ;;  %v200_v14 = vpack.c.bf16 %v56_v11, %v54_v10  ;;  %v58_v16 = vld [vmem:[#allocation6 + $0x40] sm:$0xff]  ;;  %p277_p2 = scmp.ne.s32.totalorder %s185_s12, %s276_s13  ;;  %p282_p4 = scmp.lt.s32.totalorder %s276_s13, %s276_s13 }
  0x2a   :  { %197 = vmatpush1.bf16.msra.mxu0 %v196_v8  ;;  %v202_v15 = vpack.c.bf16 %v61_v13, %v59_v12  ;;  %v60_v17 = vld [vmem:[#allocation6 + $0x50] sm:$0xff]  ;;  %v63_v18 = vld [vmem:[#allocation6 + $0x68] sm:$0xff]  ;;  %v65_v19 = vld [vmem:[#allocation6 + $0x78] sm:$0xff]  ;;  %v166_v52 = vsub.s32 0, %v165_v51  ;;  %v170_v54 = vsub.s32 1, %v165_v51 }
  0x2b   :  { %199 = vmatprep.subr.bf16.mxu0 %v198_v9  ;;  %v204_v20 = vpack.c.bf16 %v60_v17, %v58_v16  ;;  %v206_v21 = vpack.c.bf16 %v65_v19, %v63_v18  ;;  %v62_v22 = vld [vmem:[#allocation6 + $0x60] sm:$0xff]  ;;  %v64_v23 = vld [vmem:[#allocation6 + $0x70] sm:$0xff]  ;;  %v67_v24 = vld [vmem:[#allocation6 + $0x88] sm:$0xff]  ;;  %p283_p5 = por %p282_p4, %p281_p3 }
  0x2c   :  { %v69_v25 = vld [vmem:[#allocation6 + $0x98] sm:$0xff]  ;;  %v208_v26 = vpack.c.bf16 %v64_v23, %v62_v22  ;;  %v66_v28 = vld [vmem:[#allocation6 + $0x80] sm:$0xff]  ;;  %v68_v29 = vld [vmem:[#allocation6 + $0x90] sm:$0xff] }
  0x2d   :  { %v210_v27 = vpack.c.bf16 %v69_v25, %v67_v24  ;;  %v71_v30 = vld [vmem:[#allocation6 + $0xa8] sm:$0xff]  ;;  %v73_v31 = vld [vmem:[#allocation6 + $0xb8] sm:$0xff]  ;;  %v212_v32 = vpack.c.bf16 %v68_v29, %v66_v28  ;;  %v70_v34 = vld [vmem:[#allocation6 + $0xa0] sm:$0xff]  ;;  %p284_p6 = pnand %p283_p5, %p277_p2 }
  0x2e   :  { %201 = vmatpush1.bf16.msra.mxu0 %v200_v14  ;;  %v214_v33 = vpack.c.bf16 %v73_v31, %v71_v30  ;;  %v72_v35 = vld [vmem:[#allocation6 + $0xb0] sm:$0xff]  ;;  %v75_v36 = vld [vmem:[#allocation6 + $0xc8] sm:$0xff]  ;;  %v77_v37 = vld [vmem:[#allocation6 + $0xd8] sm:$0xff] }
  0x2f   :  { %203 = vmatprep.subr.bf16.mxu0 %v202_v15  ;;  %v216_v38 = vpack.c.bf16 %v72_v35, %v70_v34  ;;  %v218_v39 = vpack.c.bf16 %v77_v37, %v75_v36  ;;  %v74_v40 = vld [vmem:[#allocation6 + $0xc0] sm:$0xff]  ;;  %v76_v41 = vld [vmem:[#allocation6 + $0xd0] sm:$0xff]  ;;  %v79_v42 = vld [vmem:[#allocation6 + $0xe8] sm:$0xff] }
  0x30   :  { %v81_v43 = vld [vmem:[#allocation6 + $0xf8] sm:$0xff]  ;;  %v220_v44 = vpack.c.bf16 %v76_v41, %v74_v40  ;;  %v78_v46 = vld [vmem:[#allocation6 + $0xe0] sm:$0xff]  ;;  %v80_v47 = vld [vmem:[#allocation6 + $0xf0] sm:$0xff] }
  0x31   :  { %v222_v45 = vpack.c.bf16 %v81_v43, %v79_v42  ;;  %v224_v48 = vpack.c.bf16 %v80_v47, %v78_v46  ;;  %v49_v49 = vld [vmem:[#allocation3] sm:$0xff] }
  0x32   :  { %205 = vmatpush1.bf16.msra.mxu0 %v204_v20  ;;  %v162_v53 = vld [vmem:[%s378_s2] sm:$0x3] }
  0x33   :  { %207 = vmatprep.subr.bf16.mxu0 %v206_v21  ;;  %v167_v55 = vrot.slane %v162_v53, %v166_v52  ;;  %v171_v56 = vrot.slane %v162_v53, %v170_v54 }
  0x36   :  { %209 = vmatpush1.bf16.msra.mxu0 %v208_v26 }
  0x37   :  { %211 = vmatprep.subr.bf16.mxu0 %v210_v27 }
  0x3a   :  { %213 = vmatpush1.bf16.msra.mxu0 %v212_v32 }
  0x3b   :  { %215 = vmatprep.subr.bf16.mxu0 %v214_v33 }
  0x3e   :  { %217 = vmatpush1.bf16.msra.mxu0 %v216_v38 }
  0x3f   :  { %219 = vmatprep.subr.bf16.mxu0 %v218_v39 }
  0x42   :  { %221 = vmatpush1.bf16.msra.mxu0 %v220_v44 }
  0x43   :  { %223 = vmatprep.subr.bf16.mxu0 %v222_v45 }
  0x46   :  { %225 = vmatpush1.bf16.msra.mxu0 %v224_v48 }
  0x49   :  { %147 = vmatmul.mubr.f32.vlgmr.msra.gmra.mrb[0].mxu0 %v49_v49 }
 0x11c   :  { %v148_v57 = vpop.f32.mrb[0].mxu0 }
 0x11d   :  { %v174_v58 = vadd.f32 %v167_v55, %v148_v57  ;;  %v150_v59 = vpop.f32.mrb[1].mxu0 }
 0x11e   :  { %v175_v60 = vadd.f32 %v171_v56, %v150_v59 }
 0x11f   :  { %176 = vst [vmem:[#allocation8] sm:$0xff] %v174_v58 }
 0x120   :  { %177 = vst [vmem:[#allocation8 + $0x8] sm:$0xff] %v175_v60 }
 0x121   :  { %287 = shalt.err (!%p284_p6)
}
 0x122   :  { %s288_s15 = scalar_lea.hbm %s379_s3, 256 }
 0x123   :  { %p289_p7 = scmp.ne.s32.totalorder %s379_s3, %s288_s15  ;;  %p292_p8 = scmp.lt.u32.totalorder %s288_s15, %s379_s3 }
 0x125   :  { %p294_p9 = pnand %p292_p8, %p289_p7 }
 0x127   :  { %297 = shalt.err (!%p294_p9)
}
 0x128   :  { %187 = dma.vmem_to_hbm [thread:$0]  %s185_s12, 256, %s379_s3, [#allocation5]  }
 0x129   :  { %302 = dma.done.wait [#allocation5], 256  }
 0x12a   :  { %303 = vsyncadd [#allocation5], 4294967040 }
 0x12b   :  { %191 = vsyncpa [#allocation4], 1 }
 0x12c   :  { %192 = vsyncpa [#allocation7], 1 }
 0x12d   :  { %193 = vsyncpa [#allocation5], 1 }

</bundles_post_ra>
